<compile_context>
chip_gen: v7x
topology: tpu7x:2x2x1
jax: 0.10.0
libtpu: 0.0.40
codegen_flags: <defaults>
</compile_context>

<pallas_src>
import functools

import jax
import jax.numpy as jnp
from jax.experimental import pallas as pl
from jax.experimental.pallas import tpu as pltpu


def _round_up(x: int, m: int) -> int:
    return ((x + m - 1) // m) * m


def _cdiv(a: int, b: int) -> int:
    return (a + b - 1) // b


def _vmem_capacity_bytes() -> int:
    try:
        return int(pltpu.get_tpu_info().vmem_capacity_bytes)
    except Exception:
        return 64 * 1024 * 1024  # conservative fallback (v7x per-core VMEM)


def bow_kernel(x_ref, wt_ref, b_ref, o_ref, *, vocab, tk, w_resident):
    """One (batch-tile i, vocab-tile k) grid step.

    x_ref:  (tb, tk)          activations tile (straight from HBM, no pad copy)
    wt_ref: (tk, LP) / (Vk,LP) pre-transposed, lane-padded weight (streamed / resident)
    b_ref:  (1, LP)           lane-padded bias (padded lanes = -1e30)
    o_ref:  (tb, LP)          f32 output block; doubles as the reduction accumulator
    """
    k = pl.program_id(1)

    @pl.when(k == 0)
    def _init():
        o_ref[...] = jnp.zeros_like(o_ref)

    x = x_ref[...]
    if vocab % tk != 0:
        # Partial tail vocab tile: the DMA leaves garbage in the out-of-bounds
        # columns -> mask them to 0 so they contribute nothing to the dot.
        col = jax.lax.broadcasted_iota(jnp.int32, (1, tk), 1) + k * tk
        x = jnp.where(col < vocab, x, 0)

    if w_resident:
        off = pl.multiple_of(k * tk, 128)
        w = wt_ref[pl.ds(off, tk), :]
    else:
        w = wt_ref[...]

    o_ref[...] += jnp.dot(x, w, preferred_element_type=jnp.float32)

    @pl.when(k == pl.num_programs(1) - 1)
    def _finalize():
        # Bias add + numerically stable log_softmax over the label (lane) axis.
        # Padded label lanes carry bias = -1e30 (accumulator stays f32), so they
        # never win the max and contribute exp(-huge) == 0 to the sum; they are
        # sliced off in the wrapper.  NOTE: strictly row-local math -- the
        # garbage rows of a partial batch tile never mix with valid rows.
        logits = o_ref[...] + b_ref[...]
        m = jnp.max(logits, axis=-1, keepdims=True)
        shifted = logits - m
        lse = jnp.log(jnp.sum(jnp.exp(shifted), axis=-1, keepdims=True))
        o_ref[...] = (shifted - lse).astype(o_ref.dtype)


@jax.jit
def bow_classifier(bow_vector, weight, bias):
    """log_softmax(bow_vector @ weight.T + bias, axis=1) via Pallas.

    bow_vector: (batch, vocab)  -- streamed in its native dtype (f32 or bf16)
    weight:     (num_labels, vocab)
    bias:       (num_labels,)
    """
    batch, vocab = bow_vector.shape
    num_labels = weight.shape[0]
    in_dtype = bow_vector.dtype
    isz = jnp.dtype(in_dtype).itemsize

    LP = _round_up(max(num_labels, 1), 128)      # lane-padded label axis
    tk = min(2048, _round_up(vocab, 128))        # vocab tile (reduction)
    nk = _cdiv(vocab, tk)
    Vk = nk * tk                                 # zero-padded vocab extent for W^T

    # ---- generation-aware tile / VMEM planning -------------------------------
    vmem_cap = _vmem_capacity_bytes()
    tile_budget = vmem_cap // 2                  # leave headroom for the compiler

    # Make W^T fully VMEM-resident when cheap (saves re-streaming it once per
    # batch tile).  Constant-index blocks are still double-buffered by default,
    # so budget two copies.
    w_resident = 2 * Vk * LP * isz <= min(8 << 20, tile_budget // 3)
    w_bytes = (2 * Vk * LP * isz) if w_resident else (2 * tk * LP * isz)

    tb = 8
    for cand in (2048, 1024, 512, 256, 128, 64, 32, 16, 8):
        ws = 2 * cand * tk * isz + w_bytes + 2 * cand * LP * 4 + 2 * LP * 4
        if ws <= tile_budget:
            tb = cand
            break
    # Keep >= 2 batch tiles whenever the batch is splittable so the "parallel"
    # batch axis can shard across both v7x TensorCores.
    tb = min(tb, max(8, _round_up(_cdiv(batch, 2), 8)))
    nb = _cdiv(batch, tb)

    # ---- tiny operand re-layout (weight/bias only; x is untouched) -----------
    wT = jnp.zeros((Vk, LP), in_dtype).at[:vocab, :num_labels].set(
        weight.T.astype(in_dtype))
    b = jnp.full((1, LP), -1e30, jnp.float32).at[0, :num_labels].set(
        bias.astype(jnp.float32))

    if w_resident:
        w_spec = pl.BlockSpec((Vk, LP), lambda i, k: (0, 0))   # fetched once
    else:
        w_spec = pl.BlockSpec((tk, LP), lambda i, k: (k, 0))   # streamed per k

    cost = pl.CostEstimate(
        flops=2 * batch * vocab * LP,
        transcendentals=batch * LP,
        bytes_accessed=batch * vocab * isz + Vk * LP * isz + batch * LP * 4 + LP * 4,
    )

    kernel = functools.partial(bow_kernel, vocab=vocab, tk=tk, w_resident=w_resident)

    out = pl.pallas_call(
        kernel,
        out_shape=jax.ShapeDtypeStruct((batch, LP), jnp.float32),
        grid_spec=pltpu.PrefetchScalarGridSpec(
            num_scalar_prefetch=0,
            grid=(nb, nk),
            in_specs=[
                pl.BlockSpec((tb, tk), lambda i, k: (i, k)),   # x tile (no pad copy)
                w_spec,                                        # W^T
                pl.BlockSpec((1, LP), lambda i, k: (0, 0)),    # bias
            ],
            out_specs=pl.BlockSpec((tb, LP), lambda i, k: (i, 0)),
        ),
        compiler_params=pltpu.CompilerParams(
            # batch axis shards across TensorCores (v7x megacore); vocab is the
            # reduction carried in the resident output block -> "arbitrary", last.
            dimension_semantics=("parallel", "arbitrary"),
            vmem_limit_bytes=int(vmem_cap * 3 // 4),
        ),
        cost_estimate=cost,
    )(bow_vector, wT, b)

    return out[:, :num_labels]


def reference(bow_vector, weight, bias):
    logits = bow_vector @ weight.T + bias
    return jax.nn.log_softmax(logits, axis=1)


def _make_inputs(key, batch, vocab, num_labels):
    kx, kw, kb = jax.random.split(key, 3)
    bound = 1.0 / float(vocab) ** 0.5
    weight = jax.random.uniform(kw, (num_labels, vocab), jnp.float32, -bound, bound)
    bias = jax.random.uniform(kb, (num_labels,), jnp.float32, -bound, bound)
    # Synthetic bag-of-words counts (non-negative small integers as floats).
    bow = jax.random.randint(kx, (batch, vocab), 0, 5).astype(jnp.float32)
    return bow, weight, bias


if __name__ == "__main__":
    key = jax.random.PRNGKey(0)

    # Small shape matching the tutorial module (num_labels=3).
    bow, weight, bias = _make_inputs(key, batch=2, vocab=32, num_labels=3)
    out = jax.block_until_ready(bow_classifier(bow, weight, bias))
    ref = reference(bow, weight, bias)
    assert out.shape == (2, 3)
    assert jnp.allclose(out, ref, atol=1e-5, rtol=1e-5), "f32 mismatch vs reference"

    # Ragged shape: exercises the partial batch tile, the multi-step vocab
    # reduction into the output block, and the in-kernel tail-column mask.
    bow2, weight2, bias2 = _make_inputs(jax.random.PRNGKey(0), batch=37,
                                        vocab=2500, num_labels=5)
    out2 = jax.block_until_ready(bow_classifier(bow2, weight2, bias2))
    ref2 = reference(bow2, weight2, bias2)
    assert out2.shape == (37, 5)
    assert jnp.allclose(out2, ref2, atol=1e-4, rtol=1e-4), "ragged-shape mismatch"

    # bf16-activation path (no wrapper cast: only taken when x is already bf16).
    out_bf16 = jax.block_until_ready(
        bow_classifier(bow.astype(jnp.bfloat16), weight, bias))
    ref_bf16 = reference(
        bow.astype(jnp.bfloat16).astype(jnp.float32),
        weight.astype(jnp.bfloat16).astype(jnp.float32),
        bias)
    assert jnp.allclose(out_bf16, ref_bf16, atol=1e-2, rtol=1e-2), "bf16 mismatch"

    print("KERNEL_OK")
</pallas_src>

<mosaic_0001>
module attributes {stable_mosaic.version = 11 : i64} {
  func.func @bow_kernel(%arg0: i32, %arg1: i32, %arg2: memref<8x128xf32, #tpu.memory_space<vmem>>, %arg3: memref<128x128xf32, #tpu.memory_space<vmem>>, %arg4: memref<1x128xf32, #tpu.memory_space<vmem>>, %arg5: memref<8x128xf32, #tpu.memory_space<vmem>>) attributes {dimension_semantics = [#tpu.dimension_semantics<parallel>, #tpu.dimension_semantics<arbitrary>], iteration_bounds = array<i64: 1, 1>, scalar_prefetch = 0 : i64, scratch_operands = 0 : i64, tpu.core_type = #tpu.core_type<tc>, window_params = [{transform_indices = @transform_0, window_bounds = array<i64: 8, 128>}, {pipeline_mode = #tpu.pipeline_mode<synchronous>, transform_indices = @transform_1, window_bounds = array<i64: 128, 128>}, {pipeline_mode = #tpu.pipeline_mode<synchronous>, transform_indices = @transform_2, window_bounds = array<i64: 1, 128>}, {transform_indices = @transform_3, window_bounds = array<i64: 8, 128>}]} {
    %c0_i32 = arith.constant 0 : i32
    %0 = arith.cmpi eq, %arg1, %c0_i32 : i32
    %1 = arith.extui %0 : i1 to i32
    %c0_i32_0 = arith.constant 0 : i32
    %2 = arith.cmpi ne, %1, %c0_i32_0 : i32
    scf.if %2 {
      %cst_11 = arith.constant 0.000000e+00 : f32
      %26 = vector.broadcast %cst_11 : f32 to vector<8x128xf32>
      %c0_12 = arith.constant 0 : index
      %c0_13 = arith.constant 0 : index
      %27 = vector.load %arg5[%c0_12, %c0_13] : memref<8x128xf32, #tpu.memory_space<vmem>>, vector<8x128xf32>
      tpu.vector_store %arg5[%c0_12, %c0_13], %26 {strides = array<i32>} : memref<8x128xf32, #tpu.memory_space<vmem>>, vector<8x128xf32>,
    } else {
    }
    %c0 = arith.constant 0 : index
    %c0_1 = arith.constant 0 : index
    %3 = vector.load %arg2[%c0, %c0_1] : memref<8x128xf32, #tpu.memory_space<vmem>>, vector<8x128xf32>
    %4 = tpu.iota {dimensions = array<i32: 1>} : vector<1x128xi32>
    %c128_i32 = arith.constant 128 : i32
    %5 = arith.muli %arg1, %c128_i32 : i32
    %6 = vector.broadcast %5 : i32 to vector<1x128xi32>
    %7 = arith.addi %4, %6 : vector<1x128xi32>
    %c32_i32 = arith.constant 32 : i32
    %8 = vector.broadcast %c32_i32 : i32 to vector<1x128xi32>
    %9 = arith.cmpi slt, %7, %8 : vector<1x128xi32>
    %c0_i32_2 = arith.constant 0 : i32
    %10 = arith.sitofp %c0_i32_2 : i32 to f32
    %11 = vector.shape_cast %9 : vector<1x128xi1> to vector<1x128xi1>
    %12 = vector.broadcast %11 : vector<1x128xi1> to vector<8x128xi1>
    %13 = vector.broadcast %10 : f32 to vector<8x128xf32>
    %14 = arith.select %12, %3, %13 : vector<8x128xi1>, vector<8x128xf32>
    %c128_i32_3 = arith.constant 128 : i32
    %15 = arith.muli %arg1, %c128_i32_3 : i32
    %16 = tpu.assume_multiple %15, 128 : i32
    %17 = arith.index_cast %16 : i32 to index
    %c0_4 = arith.constant 0 : index
    %18 = vector.load %arg3[%17, %c0_4] : memref<128x128xf32, #tpu.memory_space<vmem>>, vector<128x128xf32>
    %c0_5 = arith.constant 0 : index
    %c0_6 = arith.constant 0 : index
    %19 = vector.load %arg5[%c0_5, %c0_6] : memref<8x128xf32, #tpu.memory_space<vmem>>, vector<8x128xf32>
    %cst = arith.constant dense<0.000000e+00> : vector<8x128xf32>
    %20 = tpu.matmul %14, %18, %cst {dimension_numbers = #tpu.dot_dimension_numbers<[1], [0], [0], [1], [0, 0, 1, 1], [], []>} : vector<8x128xf32>, vector<128x128xf32>, vector<8x128xf32> -> vector<8x128xf32>
    %21 = arith.addf %19, %20 : vector<8x128xf32>
    %c0_7 = arith.constant 0 : index
    %c0_8 = arith.constant 0 : index
    %22 = vector.load %arg5[%c0_7, %c0_8] : memref<8x128xf32, #tpu.memory_space<vmem>>, vector<8x128xf32>
    tpu.vector_store %arg5[%c0_7, %c0_8], %21 {strides = array<i32>} : memref<8x128xf32, #tpu.memory_space<vmem>>, vector<8x128xf32>,
    %c0_i32_9 = arith.constant 0 : i32
    %23 = arith.cmpi eq, %arg1, %c0_i32_9 : i32
    %24 = arith.extui %23 : i1 to i32
    %c0_i32_10 = arith.constant 0 : i32
    %25 = arith.cmpi ne, %24, %c0_i32_10 : i32
    scf.if %25 {
      %c0_11 = arith.constant 0 : index
      %c0_12 = arith.constant 0 : index
      %26 = vector.load %arg5[%c0_11, %c0_12] : memref<8x128xf32, #tpu.memory_space<vmem>>, vector<8x128xf32>
      %c0_13 = arith.constant 0 : index
      %c0_14 = arith.constant 0 : index
      %27 = vector.load %arg4[%c0_13, %c0_14] : memref<1x128xf32, #tpu.memory_space<vmem>>, vector<1x128xf32>
      %28 = vector.broadcast %27 : vector<1x128xf32> to vector<8x128xf32>
      %29 = arith.addf %26, %28 : vector<8x128xf32>
      %cst_15 = arith.constant dense<0xFF800000> : vector<8xf32>
      %30 = vector.multi_reduction <maximumf>, %29, %cst_15 [1] : vector<8x128xf32> to vector<8xf32>
      %31 = vector.shape_cast %30 : vector<8xf32> to vector<8x1xf32>
      %32 = vector.broadcast %31 : vector<8x1xf32> to vector<8x128xf32>
      %33 = arith.subf %29, %32 : vector<8x128xf32>
      %34 = math.exp %33 : vector<8x128xf32>
      %cst_16 = arith.constant dense<0.000000e+00> : vector<8xf32>
      %35 = vector.multi_reduction <add>, %34, %cst_16 [1] : vector<8x128xf32> to vector<8xf32>
      %36 = vector.shape_cast %35 : vector<8xf32> to vector<8x1xf32>
      %37 = math.log %36 : vector<8x1xf32>
      %38 = vector.broadcast %37 : vector<8x1xf32> to vector<8x128xf32>
      %39 = arith.subf %33, %38 : vector<8x128xf32>
      %c0_17 = arith.constant 0 : index
      %c0_18 = arith.constant 0 : index
      %40 = vector.load %arg5[%c0_17, %c0_18] : memref<8x128xf32, #tpu.memory_space<vmem>>, vector<8x128xf32>
      tpu.vector_store %arg5[%c0_17, %c0_18], %39 {strides = array<i32>} : memref<8x128xf32, #tpu.memory_space<vmem>>, vector<8x128xf32>,
    } else {
    }
    return
  }
  func.func @transform_0(%arg0: i32, %arg1: i32) -> (i32, i32) {
    %c0_i32 = arith.constant 0 : i32
    return %arg0, %arg1 : i32, i32
  }
  func.func @transform_1(%arg0: i32, %arg1: i32) -> (i32, i32) {
    %c0_i32 = arith.constant 0 : i32
    %c0_i32_0 = arith.constant 0 : i32
    %c0_i32_1 = arith.constant 0 : i32
    return %c0_i32, %c0_i32_0 : i32, i32
  }
  func.func @transform_2(%arg0: i32, %arg1: i32) -> (i32, i32) {
    %c0_i32 = arith.constant 0 : i32
    %c0_i32_0 = arith.constant 0 : i32
    %c0_i32_1 = arith.constant 0 : i32
    return %c0_i32, %c0_i32_0 : i32, i32
  }
  func.func @transform_3(%arg0: i32, %arg1: i32) -> (i32, i32) {
    %c0_i32 = arith.constant 0 : i32
    %c0_i32_0 = arith.constant 0 : i32
    return %arg0, %c0_i32 : i32, i32
  }
}

</mosaic_0001>

<bundles_post_ra>
// kernel: bow_classifier.1
= control target key start
LH: loop header
LB: loop body
LE: loop exit
PB: predicated region body
PF: predicated region fallthrough
CT: control target
= control target key end

     0   :  { %8 = vsyncpa [#allocation3], 0  ;;  %v271_v2 = vmov 0.0|0.0   ;;  %vm272_vm0 = vmmov 0   ;;  %v273_v6 = vmov 0.0   ;;  %v21_v23 = vlaneseq  ;;  %s363_s0 = inlined_call_operand.vmem [shape: f32[2,32], index: 0, kind: input, shape index: {}]   ;;  %s364_s1 = inlined_call_operand.vmem [shape: f32[128,128], index: 1, kind: input, shape index: {}]   ;;  %s365_s2 = inlined_call_operand.vmem [shape: f32[1,128], index: 2, kind: input, shape index: {}]   ;;  %s366_s3 = inlined_call_operand.hbm [shape: f32[2,128], index: 3, kind: output, shape index: {}]  }
   0x1   :  { %v31_v0 = vld [vmem:[%s364_s1] sm:$0xff]  ;;  %v32_v1 = vld [vmem:[%s364_s1 + $0x8] sm:$0xff]  ;;  %213 = vmatprep.subr.bf16.mxu0 %v271_v2  ;;  %v33_v4 = vld [vmem:[%s364_s1 + $0x10] sm:$0xff]  ;;  %210 = vmatprep.mubr.msk.f32.mxu0 %vm272_vm0, %v273_v6 }
   0x2   :  { %v214_v3 = vpack.c.bf16 %v32_v1, %v31_v0  ;;  %v34_v5 = vld [vmem:[%s364_s1 + $0x18] sm:$0xff]  ;;  %v35_v8 = vld [vmem:[%s364_s1 + $0x20] sm:$0xff]  ;;  %v36_v9 = vld [vmem:[%s364_s1 + $0x28] sm:$0xff]  ;;  %v22_v27 = vand.u32 127, %v21_v23 }
   0x3   :  { %v217_v7 = vpack.c.bf16 %v34_v5, %v33_v4  ;;  %v220_v10 = vpack.c.bf16 %v36_v9, %v35_v8  ;;  %v37_v11 = vld [vmem:[%s364_s1 + $0x30] sm:$0xff]  ;;  %v38_v12 = vld [vmem:[%s364_s1 + $0x38] sm:$0xff]  ;;  %v39_v14 = vld [vmem:[%s364_s1 + $0x40] sm:$0xff] }
   0x4   :  { %215 = vmatpush3.bf16.msra.mxu0 %v214_v3  ;;  %v223_v13 = vpack.c.bf16 %v38_v12, %v37_v11  ;;  %v40_v15 = vld [vmem:[%s364_s1 + $0x48] sm:$0xff]  ;;  %v41_v17 = vld [vmem:[%s364_s1 + $0x50] sm:$0xff]  ;;  %v42_v18 = vld [vmem:[%s364_s1 + $0x58] sm:$0xff]  ;;  %vm26_vm1 = vcmp.lt.s32.totalorder %v22_v27, 32 }
   0x5   :  { %216 = vmatprep.subr.bf16.mxu0 %v271_v2  ;;  %v226_v16 = vpack.c.bf16 %v40_v15, %v39_v14  ;;  %v229_v19 = vpack.c.bf16 %v42_v18, %v41_v17  ;;  %v43_v20 = vld [vmem:[%s364_s1 + $0x60] sm:$0xff]  ;;  %v44_v21 = vld [vmem:[%s364_s1 + $0x68] sm:$0xff]  ;;  %v45_v24 = vld [vmem:[%s364_s1 + $0x70] sm:$0xff] }
   0x6   :  { %v232_v22 = vpack.c.bf16 %v44_v21, %v43_v20  ;;  %v46_v25 = vld [vmem:[%s364_s1 + $0x78] sm:$0xff]  ;;  %v20_v28 = vld [vmem:[%s363_s0] sm:$0xff] }
   0x7   :  { %v235_v26 = vpack.c.bf16 %v46_v25, %v45_v24  ;;  %v160_v30 = vld [vmem:[%s365_s2] ss:$0 sm:$0xff] }
   0x8   :  { %218 = vmatpush3.bf16.msra.mxu0 %v217_v7 }
   0x9   :  { %219 = vmatprep.subr.bf16.mxu0 %v271_v2 }
   0xc   :  { %221 = vmatpush3.bf16.msra.mxu0 %v220_v10 }
   0xd   :  { %222 = vmatprep.subr.bf16.mxu0 %v271_v2 }
  0x10   :  { %224 = vmatpush3.bf16.msra.mxu0 %v223_v13 }
  0x11   :  { %225 = vmatprep.subr.bf16.mxu0 %v271_v2 }
  0x14   :  { %227 = vmatpush3.bf16.msra.mxu0 %v226_v16 }
  0x15   :  { %228 = vmatprep.subr.bf16.mxu0 %v271_v2 }
  0x18   :  { %230 = vmatpush3.bf16.msra.mxu0 %v229_v19 }
  0x19   :  { %231 = vmatprep.subr.bf16.mxu0 %v271_v2 }
  0x1c   :  { %233 = vmatpush3.bf16.msra.mxu0 %v232_v22 }
  0x1d   :  { %234 = vmatprep.subr.bf16.mxu0 %v271_v2 }
  0x20   :  { %236 = vmatpush3.bf16.msra.mxu0 %v235_v26 }
  0x23   :  { %211 = vmatmul.mubr.msk.f32.vlgmr.msra.gmra.mrb[0].mxu0 %vm26_vm1, %v20_v28 }
  0xf6   :  { %v114_v29 = vpop.f32.mrb[0].mxu0 }
  0xf7   :  { %v212_v31 = vpop.f32.mrb[1].mxu0  ;;  %v131_v32 = vadd.f32 %v160_v30, %v114_v29 }
  0xf9   :  { %132 = vmax.xlane.f32.xlu0 %v131_v32 }
 0x186   :  { %v133_v33 = vpop.xlane.xlu0 %132 }
 0x187   :  { %v134_v34 = vsub.f32 %v131_v32, %v133_v33 }
 0x189   :  { %v135_v35 = vmul.f32 1.442695, %v134_v34 }
 0x18b   :  { %243 = vpow2.f32 %v135_v35 }
 0x195   :  { %v244_v36 = vpop.eup %243 }
 0x196   :  { %137 = vadd.xlane.f32.xlu0 %v244_v36 }
 0x223   :  { %v138_v37 = vpop.xlane.xlu0 %137 }
 0x224   :  { %245 = vlog2.f32 %v138_v37 }
 0x22e   :  { %v246_v38 = vpop.eup %245 }
 0x22f   :  { %v140_v39 = vmul.f32 0.6931472, %v246_v38 }
 0x231   :  { %v141_v40 = vsub.f32 %v134_v34, %v140_v39 }
 0x233   :  { %142 = vst [vmem:[#allocation2] sm:$0xff] %v141_v40 }
 0x234   :  { %147 = vsyncadd [#allocation3], 96  ;;  %s274_s0 = smov [#allocation2]  }
 0x235   :  { %s148_s1 = sshll.u32 %s274_s0, 4  ;;  %s149_s1 = int_to_ptr.vmem [resolvable:$true] %s148_s1 }
 0x236   :  { %s247_s2 = scalar_lea.vmem %s149_s1, 32  ;;  %s251_s21 = scalar_lea.vmem %s149_s1, 128 }
 0x237   :  { %p248_p0 = scmp.ne.s32.totalorder %s149_s1, %s247_s2  ;;  %p252_p1 = scmp.lt.s32.totalorder %s149_s1, %s149_s1 }
 0x238   :  { %p253_p2 = scmp.lt.s32.totalorder %s251_s21, %s247_s2 }
 0x23a   :  { %p254_p3 = por %p253_p2, %p252_p1 }
 0x23c   :  { %p255_p4 = pnand %p254_p3, %p248_p0 }
 0x23e   :  { %258 = shalt.err (!%p255_p4)
}
 0x23f   :  { %s259_s24 = scalar_lea.hbm %s366_s3, 32 }
 0x240   :  { %p260_p5 = scmp.ne.s32.totalorder %s366_s3, %s259_s24  ;;  %p263_p6 = scmp.lt.u32.totalorder %s259_s24, %s366_s3 }
 0x242   :  { %p265_p7 = pnand %p263_p6, %p260_p5 }
 0x244   :  { %268 = shalt.err (!%p265_p7)
}
 0x245   :  { %s275_s29 = smov 32   ;;  %s276_s30 = smov 2  }
 0x246   :  { %154 = dma.vmem_to_hbm [thread:$0]  %s149_s1, 32, %s366_s3, [#allocation3], %s275_s29, %s275_s29, %s276_s30  }
 0x247   :  { %269 = dma.done.wait [#allocation3], 128  }
 0x248   :  { %270 = vsyncadd [#allocation3], 4294967168 }
 0x249   :  { %158 = vsyncpa [#allocation3], 1 }

</bundles_post_ra>
